<compile_context>
chip_gen: v7x
topology: tpu7x:2x2x1
jax: 0.10.0
libtpu: 0.0.40
codegen_flags: <defaults>
</compile_context>

<pallas_src>
import functools

import jax
import jax.numpy as jnp
from jax.experimental import pallas as pl
from jax.experimental.pallas import tpu as pltpu


def _rope_cache_kernel(aux_ref, cos_ref, sin_ref, *, ppr, dim, halve):
    """Fill one (tile, width) slab of the rotary cos/sin cache.

    aux_ref: (3, width) f32 constant table.
      row 0: per-lane position offset (lane // dim on the packed path, zeros
             on the natural-layout fallback).
      row 1: per-lane inv_freq, i.e. concat(inv_freq, inv_freq) tiled `ppr`
             times (torch.cat((freqs, freqs), -1) folded in); zero in padding
             lanes on the fallback path.
      row 2: 0/1 selector, 1 on the "duplicate half" lanes of each position
             (only used when halve=True).
    cos_ref / sin_ref: (tile, width) output slabs.
    """
    out_rows, width = cos_ref.shape
    aux = aux_ref[...]                          # tiny (3, width) table
    lane_pos = aux[0:1, :]
    inv_lane = aux[1:2, :]
    base = (pl.program_id(0) * out_rows).astype(jnp.float32)

    if halve:
        # Compute cos/sin once on a lane-dense slab of UNIQUE frequencies:
        # computed row r serves output row base+r (its sel==0 lanes) and
        # output row base+half+r (its sel==1 lanes).
        half = out_rows // 2
        sel = aux[2:3, :]
        r = jax.lax.broadcasted_iota(jnp.int32, (half, width), 0).astype(jnp.float32)
        row_eff = base + r + sel * float(half)          # exact integers in f32
        pos = row_eff * float(ppr) + lane_pos           # exact up to 2^24 positions
        freqs = pos * inv_lane                          # single rounding == jnp.outer
        c = jnp.cos(freqs)
        s = jnp.sin(freqs)

        take_here = sel < 0.5                           # lanes whose value is already in place
        shift_lo = dim // 2                             # pull unique (sel==0) lanes into dup lanes
        shift_hi = width - dim // 2                     # pull unique (sel==1) lanes into dup lanes
        cos_lo = jnp.where(take_here, c, pltpu.roll(c, shift_lo, axis=1))
        sin_lo = jnp.where(take_here, s, pltpu.roll(s, shift_lo, axis=1))
        cos_hi = jnp.where(take_here, pltpu.roll(c, shift_hi, axis=1), c)
        sin_hi = jnp.where(take_here, pltpu.roll(s, shift_hi, axis=1), s)

        cos_ref[pl.ds(0, half), :] = cos_lo.astype(cos_ref.dtype)
        sin_ref[pl.ds(0, half), :] = sin_lo.astype(sin_ref.dtype)
        cos_ref[pl.ds(half, half), :] = cos_hi.astype(cos_ref.dtype)
        sin_ref[pl.ds(half, half), :] = sin_hi.astype(sin_ref.dtype)
    else:
        r = jax.lax.broadcasted_iota(jnp.int32, (out_rows, width), 0).astype(jnp.float32)
        pos = (base + r) * float(ppr) + lane_pos
        freqs = pos * inv_lane
        cos_ref[...] = jnp.cos(freqs).astype(cos_ref.dtype)
        sin_ref[...] = jnp.sin(freqs).astype(sin_ref.dtype)


@functools.partial(
    jax.jit, static_argnames=("rows", "tile", "ppr", "dim", "halve", "out_dtype")
)
def _build_cos_sin_cache(aux, rows, tile, ppr, dim, halve, out_dtype):
    """aux: (3, width) f32.  Returns (cos, sin), each (rows, width) of out_dtype."""
    width = aux.shape[-1]
    grid = (rows // tile,)
    out_sds = jax.ShapeDtypeStruct((rows, width), out_dtype)
    kernel = functools.partial(_rope_cache_kernel, ppr=ppr, dim=dim, halve=halve)
    # The (3, width) aux block is re-fetched each grid step, but at ~1.5 KiB it
    # is noise next to the MiBs of output written per step.
    cos, sin = pl.pallas_call(
        kernel,
        out_shape=(out_sds, out_sds),
        grid_spec=pltpu.PrefetchScalarGridSpec(
            num_scalar_prefetch=0,
            grid=grid,
            in_specs=[pl.BlockSpec((3, width), lambda i: (0, 0))],
            out_specs=[
                pl.BlockSpec((tile, width), lambda i: (i, 0)),
                pl.BlockSpec((tile, width), lambda i: (i, 0)),
            ],
        ),
        compiler_params=pltpu.CompilerParams(
            dimension_semantics=("parallel",),
            vmem_limit_bytes=32 * 1024 * 1024,
        ),
    )(aux)
    return cos, sin


class TaosRotaryEmbeddingPallas:
    """JAX/Pallas port of TaosRotaryEmbedding.

    The cos/sin cache construction (outer product + cos/sin) runs in a Pallas
    TPU kernel with large, lane-dense tiles.  Forward returns
    (cos[:seq_len], sin[:seq_len]) cast to x.dtype, matching the torch module.
    Pass dtype=jnp.bfloat16 to build the cache directly in the compute dtype
    (halves HBM writeback and removes the per-forward astype copy).
    """

    def __init__(self, dim, max_position_embeddings=10000, base=10000,
                 dtype=jnp.float32, tile_rows=4096, halve_transcendentals=True):
        assert dim > 0 and dim % 2 == 0, "TaosRotaryEmbedding requires an even dim"
        self.dim = dim
        self.max_position_embeddings = max_position_embeddings
        self.base = base
        self.cache_dtype = jnp.dtype(dtype)    # emit target dtype directly
        self.tile_rows = int(tile_rows)

        # inv_freq = 1 / base ** (arange(0, dim, 2) / dim), shape (dim//2,)
        exponents = jnp.arange(0, dim, 2, dtype=jnp.float32) / dim
        self.inv_freq = (1.0 / (base ** exponents)).astype(jnp.float32)
        inv_full = jnp.concatenate([self.inv_freq, self.inv_freq], axis=-1)  # (dim,)

        if dim <= 128 and 128 % dim == 0:
            # Packed lane-dense layout: ppr positions per 128-lane row.
            self._ppr = 128 // dim
            self._width = 128
            self._halve = bool(halve_transcendentals)
            lane = jnp.arange(128, dtype=jnp.int32)
            lane_pos = (lane // dim).astype(jnp.float32)
            inv_lane = jnp.tile(inv_full, self._ppr)
            sel = ((lane % dim) >= (dim // 2)).astype(jnp.float32)
        else:
            # Natural (seq, dim) layout; pad width to a multiple of 128 so all
            # kernel stores are full-width (lane padding sliced off at build).
            self._ppr = 1
            self._width = 128 * int(pl.cdiv(dim, 128))
            self._halve = False
            lane_pos = jnp.zeros((self._width,), jnp.float32)
            inv_lane = jnp.concatenate(
                [inv_full, jnp.zeros((self._width - dim,), jnp.float32)])
            sel = jnp.zeros((self._width,), jnp.float32)
        self._aux = jnp.stack([lane_pos, inv_lane, sel], axis=0)  # (3, width) f32

        self._cached_positions = 0
        self._set_cos_sin_cache(max_position_embeddings)

    def _plan_tiles(self, rows):
        """Pick (tile_rows_per_step, padded_total_rows)."""
        itemsize = self.cache_dtype.itemsize
        sub = {4: 8, 2: 16, 1: 32}.get(itemsize, 8)      # native sublane tiling
        align = 2 * sub if self._halve else sub          # halving splits the block in two
        bytes_per_row = self._width * itemsize
        # Keep 2 outputs x 2 pipeline buffers x tile x width under ~16 MiB (plus a
        # few MiB of in-kernel intermediates) against the 32 MiB vmem limit set in
        # CompilerParams; large enough to amortise the ~0.35us per-grid-step cost.
        cap = (16 * 1024 * 1024) // (4 * bytes_per_row)
        cap = max(align, (cap // align) * align)
        tile = min(max(self.tile_rows, align), cap)
        tile = max(align, (tile // align) * align)

        rows_aligned = align * int(pl.cdiv(rows, align))
        if tile >= rows_aligned:
            if rows_aligned >= 2 * align:
                # Always give the grid >= 2 steps so both v7x TensorCores get work.
                tile = align * int(pl.cdiv(rows_aligned, 2 * align))
            else:
                tile = rows_aligned
        rows_padded = tile * int(pl.cdiv(rows_aligned, tile))
        return int(tile), int(rows_padded)

    def _set_cos_sin_cache(self, seq_len):
        self.max_seq_len_cached = int(seq_len)
        # Bucket the cached length to a power of two so growing seq_len reuses
        # already-compiled kernels instead of recompiling per new length.
        padded_seq = pl.next_power_of_2(max(int(seq_len), 1))
        rows = int(pl.cdiv(padded_seq, self._ppr))
        tile, rows_padded = self._plan_tiles(rows)

        cos_flat, sin_flat = _build_cos_sin_cache(
            self._aux, rows_padded, tile, self._ppr, self.dim, self._halve,
            self.cache_dtype,
        )
        n_pos = rows_padded * self._ppr
        if self._width == self.dim * self._ppr:
            # Row-major reshape (rows, width) -> (positions, dim) is layout-free.
            self.cos_cached = cos_flat.reshape(n_pos, self.dim)
            self.sin_cached = sin_flat.reshape(n_pos, self.dim)
        else:
            # One-time lane-padding slice at build time (not per forward).
            self.cos_cached = cos_flat[:, : self.dim]
            self.sin_cached = sin_flat[:, : self.dim]
        self._cached_positions = n_pos

    def __call__(self, x, seq_len=None):
        if seq_len is None:                  # guard: original crashes on None
            seq_len = x.shape[-2]
        seq_len = int(seq_len)
        if seq_len > self._cached_positions:
            self._set_cos_sin_cache(seq_len)
        cos = self.cos_cached[:seq_len]
        sin = self.sin_cached[:seq_len]
        if cos.dtype != x.dtype:
            cos = cos.astype(x.dtype)
            sin = sin.astype(x.dtype)
        return cos, sin


def _reference(dim, base, seq_len):
    exponents = jnp.arange(0, dim, 2, dtype=jnp.float32) / dim
    inv_freq = 1.0 / (base ** exponents)
    t = jnp.arange(seq_len, dtype=jnp.float32)
    freqs = jnp.outer(t, inv_freq)
    emb = jnp.concatenate([freqs, freqs], axis=-1)
    return jnp.cos(emb), jnp.sin(emb)


if __name__ == "__main__":
    key = jax.random.PRNGKey(0)
    batch, seq, hidden, dim = 2, 8, 32, 32
    # x is only consulted for dtype / shape in the module's forward.
    x = jax.random.normal(key, (batch, seq, hidden), dtype=jnp.float32)

    rope = TaosRotaryEmbeddingPallas(dim=dim, max_position_embeddings=64, base=10000)
    cos, sin = rope(x, seq_len=seq)
    cos = jax.block_until_ready(cos)
    sin = jax.block_until_ready(sin)

    assert cos.shape == (seq, dim) and sin.shape == (seq, dim)
    assert cos.dtype == x.dtype and sin.dtype == x.dtype

    ref_cos, ref_sin = _reference(dim, 10000, seq)
    assert jnp.allclose(cos, ref_cos, atol=1e-5, rtol=1e-5)
    assert jnp.allclose(sin, ref_sin, atol=1e-5, rtol=1e-5)

    # Longer slice from the same cache exercises the packed (4 positions per
    # 128-lane row) layout plus the halved-EUP roll/select replication.
    cos50, sin50 = rope(x, seq_len=50)
    ref_cos50, ref_sin50 = _reference(dim, 10000, 50)
    assert jnp.allclose(jax.block_until_ready(cos50), ref_cos50, atol=1e-5, rtol=1e-5)
    assert jnp.allclose(jax.block_until_ready(sin50), ref_sin50, atol=1e-5, rtol=1e-5)

    # A dim that does not divide 128 takes the natural-layout fallback with the
    # output width padded to a multiple of 128 (lane-dense stores).
    rope2 = TaosRotaryEmbeddingPallas(dim=192, max_position_embeddings=32, base=10000)
    cos2, sin2 = rope2(x, seq_len=16)
    ref_cos2, ref_sin2 = _reference(192, 10000, 16)
    assert jnp.allclose(jax.block_until_ready(cos2), ref_cos2, atol=1e-5, rtol=1e-5)
    assert jnp.allclose(jax.block_until_ready(sin2), ref_sin2, atol=1e-5, rtol=1e-5)

    # Building the cache directly in bf16 halves writeback and removes the
    # per-forward astype; compare against the f32 reference loosely.
    x_bf16 = x.astype(jnp.bfloat16)
    rope3 = TaosRotaryEmbeddingPallas(dim=64, max_position_embeddings=128,
                                      base=10000, dtype=jnp.bfloat16)
    cos3, sin3 = rope3(x_bf16, seq_len=40)
    cos3 = jax.block_until_ready(cos3)
    sin3 = jax.block_until_ready(sin3)
    assert cos3.dtype == jnp.bfloat16 and cos3.shape == (40, 64)
    ref_cos3, ref_sin3 = _reference(64, 10000, 40)
    assert jnp.allclose(cos3.astype(jnp.float32), ref_cos3, atol=1e-2)
    assert jnp.allclose(sin3.astype(jnp.float32), ref_sin3, atol=1e-2)

    print("KERNEL_OK")
</pallas_src>

<mosaic_0001>
module attributes {stable_mosaic.version = 11 : i64} {
  func.func @_rope_cache_kernel(%arg0: i32, %arg1: memref<3x128xf32, #tpu.memory_space<vmem>>, %arg2: memref<16x128xf32, #tpu.memory_space<vmem>>, %arg3: memref<16x128xf32, #tpu.memory_space<vmem>>) attributes {dimension_semantics = [#tpu.dimension_semantics<parallel>], iteration_bounds = array<i64: 1>, scalar_prefetch = 0 : i64, scratch_operands = 0 : i64, tpu.core_type = #tpu.core_type<tc>, window_params = [{pipeline_mode = #tpu.pipeline_mode<synchronous>, transform_indices = @transform_0, window_bounds = array<i64: 3, 128>}, {transform_indices = @transform_1, window_bounds = array<i64: 16, 128>}, {transform_indices = @transform_2, window_bounds = array<i64: 16, 128>}]} {
    %c0 = arith.constant 0 : index
    %c0_0 = arith.constant 0 : index
    %0 = vector.load %arg1[%c0, %c0_0] : memref<3x128xf32, #tpu.memory_space<vmem>>, vector<3x128xf32>
    %1 = vector.extract_strided_slice %0 {offsets = [0, 0], sizes = [1, 128], strides = [1, 1]} : vector<3x128xf32> to vector<1x128xf32>
    %2 = vector.extract_strided_slice %0 {offsets = [1, 0], sizes = [1, 128], strides = [1, 1]} : vector<3x128xf32> to vector<1x128xf32>
    %c16_i32 = arith.constant 16 : i32
    %3 = arith.muli %arg0, %c16_i32 : i32
    %4 = arith.sitofp %3 : i32 to f32
    %5 = vector.extract_strided_slice %0 {offsets = [2, 0], sizes = [1, 128], strides = [1, 1]} : vector<3x128xf32> to vector<1x128xf32>
    %6 = tpu.iota {dimensions = array<i32: 0>} : vector<8x128xi32>
    %7 = arith.sitofp %6 : vector<8x128xi32> to vector<8x128xf32>
    %8 = vector.broadcast %4 : f32 to vector<8x128xf32>
    %9 = arith.addf %8, %7 : vector<8x128xf32>
    %cst = arith.constant 8.000000e+00 : f32
    %10 = vector.broadcast %cst : f32 to vector<1x128xf32>
    %11 = arith.mulf %5, %10 : vector<1x128xf32>
    %12 = vector.broadcast %11 : vector<1x128xf32> to vector<8x128xf32>
    %13 = arith.addf %9, %12 : vector<8x128xf32>
    %cst_1 = arith.constant 4.000000e+00 : f32
    %14 = vector.broadcast %cst_1 : f32 to vector<8x128xf32>
    %15 = arith.mulf %13, %14 : vector<8x128xf32>
    %16 = vector.broadcast %1 : vector<1x128xf32> to vector<8x128xf32>
    %17 = arith.addf %15, %16 : vector<8x128xf32>
    %18 = vector.broadcast %2 : vector<1x128xf32> to vector<8x128xf32>
    %19 = arith.mulf %17, %18 : vector<8x128xf32>
    %20 = math.cos %19 : vector<8x128xf32>
    %21 = math.sin %19 : vector<8x128xf32>
    %cst_2 = arith.constant 5.000000e-01 : f32
    %22 = vector.broadcast %cst_2 : f32 to vector<1x128xf32>
    %23 = arith.cmpf olt, %5, %22 : vector<1x128xf32>
    %c16_i32_3 = arith.constant 16 : i32
    %24 = tpu.dynamic_rotate %20 by %c16_i32_3 dim 1 : vector<8x128xf32>, i32 -> vector<8x128xf32>
    %25 = vector.shape_cast %23 : vector<1x128xi1> to vector<1x128xi1>
    %26 = vector.broadcast %25 : vector<1x128xi1> to vector<8x128xi1>
    %27 = arith.select %26, %20, %24 : vector<8x128xi1>, vector<8x128xf32>
    %c16_i32_4 = arith.constant 16 : i32
    %28 = tpu.dynamic_rotate %21 by %c16_i32_4 dim 1 : vector<8x128xf32>, i32 -> vector<8x128xf32>
    %29 = vector.shape_cast %23 : vector<1x128xi1> to vector<1x128xi1>
    %30 = vector.broadcast %29 : vector<1x128xi1> to vector<8x128xi1>
    %31 = arith.select %30, %21, %28 : vector<8x128xi1>, vector<8x128xf32>
    %c112_i32 = arith.constant 112 : i32
    %32 = tpu.dynamic_rotate %20 by %c112_i32 dim 1 : vector<8x128xf32>, i32 -> vector<8x128xf32>
    %33 = vector.shape_cast %23 : vector<1x128xi1> to vector<1x128xi1>
    %34 = vector.broadcast %33 : vector<1x128xi1> to vector<8x128xi1>
    %35 = arith.select %34, %32, %20 : vector<8x128xi1>, vector<8x128xf32>
    %c112_i32_5 = arith.constant 112 : i32
    %36 = tpu.dynamic_rotate %21 by %c112_i32_5 dim 1 : vector<8x128xf32>, i32 -> vector<8x128xf32>
    %37 = vector.shape_cast %23 : vector<1x128xi1> to vector<1x128xi1>
    %38 = vector.broadcast %37 : vector<1x128xi1> to vector<8x128xi1>
    %39 = arith.select %38, %36, %21 : vector<8x128xi1>, vector<8x128xf32>
    %c0_6 = arith.constant 0 : index
    %c0_7 = arith.constant 0 : index
    %40 = vector.load %arg2[%c0_6, %c0_7] : memref<16x128xf32, #tpu.memory_space<vmem>>, vector<8x128xf32>
    tpu.vector_store %arg2[%c0_6, %c0_7], %27 {strides = array<i32>} : memref<16x128xf32, #tpu.memory_space<vmem>>, vector<8x128xf32>,
    %c0_8 = arith.constant 0 : index
    %c0_9 = arith.constant 0 : index
    %41 = vector.load %arg3[%c0_8, %c0_9] : memref<16x128xf32, #tpu.memory_space<vmem>>, vector<8x128xf32>
    tpu.vector_store %arg3[%c0_8, %c0_9], %31 {strides = array<i32>} : memref<16x128xf32, #tpu.memory_space<vmem>>, vector<8x128xf32>,
    %c8 = arith.constant 8 : index
    %c0_10 = arith.constant 0 : index
    %42 = vector.load %arg2[%c8, %c0_10] : memref<16x128xf32, #tpu.memory_space<vmem>>, vector<8x128xf32>
    tpu.vector_store %arg2[%c8, %c0_10], %35 {strides = array<i32>} : memref<16x128xf32, #tpu.memory_space<vmem>>, vector<8x128xf32>,
    %c8_11 = arith.constant 8 : index
    %c0_12 = arith.constant 0 : index
    %43 = vector.load %arg3[%c8_11, %c0_12] : memref<16x128xf32, #tpu.memory_space<vmem>>, vector<8x128xf32>
    tpu.vector_store %arg3[%c8_11, %c0_12], %39 {strides = array<i32>} : memref<16x128xf32, #tpu.memory_space<vmem>>, vector<8x128xf32>,
    return
  }
  func.func @transform_0(%arg0: i32) -> (i32, i32) {
    %c0_i32 = arith.constant 0 : i32
    %c0_i32_0 = arith.constant 0 : i32
    %c0_i32_1 = arith.constant 0 : i32
    return %c0_i32, %c0_i32_0 : i32, i32
  }
  func.func @transform_1(%arg0: i32) -> (i32, i32) {
    %c0_i32 = arith.constant 0 : i32
    %c0_i32_0 = arith.constant 0 : i32
    return %arg0, %c0_i32 : i32, i32
  }
  func.func @transform_2(%arg0: i32) -> (i32, i32) {
    %c0_i32 = arith.constant 0 : i32
    %c0_i32_0 = arith.constant 0 : i32
    return %arg0, %c0_i32 : i32, i32
  }
}

</mosaic_0001>

<bundles_post_ra>
// kernel: _build_cos_sin_cache.1
= control target key start
LH: loop header
LB: loop body
LE: loop exit
PB: predicated region body
PF: predicated region fallthrough
CT: control target
= control target key end

     0   :  { %8 = vsyncpa [#allocation3], 0  ;;  %s511_s0 = inlined_call_operand.hbm [shape: f32[3,128], index: 0, kind: input, shape index: {}]   ;;  %s512_s1 = inlined_call_operand.hbm [shape: f32[16,128], index: 1, kind: output, shape index: {0}]   ;;  %s513_s2 = inlined_call_operand.hbm [shape: f32[16,128], index: 2, kind: output, shape index: {1}]  }
   0x1   :  { %9 = vsyncpa [#allocation4], 0 }
   0x2   :  { %10 = vsyncpa [#allocation7], 0  ;;  %s414_s9 = smov [#allocation2]   ;;  %s342_s13 = scalar_lea.hbm %s511_s0, 64 }
   0x3   :  { %s17_s10 = sshll.u32 %s414_s9, 4  ;;  %p343_p0 = scmp.ne.s32.totalorder %s511_s0, %s342_s13  ;;  %s18_s10 = int_to_ptr.vmem [resolvable:$true] %s17_s10 }
   0x4   :  { %p346_p1 = scmp.lt.u32.totalorder %s342_s13, %s511_s0 }
   0x6   :  { %p348_p2 = pnand %p346_p1, %p343_p0 }
   0x8   :  { %351 = shalt.err (!%p348_p2)
}
   0x9   :  { %s352_s18 = scalar_lea.vmem %s18_s10, 64  ;;  %p357_p4 = scmp.lt.s32.totalorder %s18_s10, %s18_s10 }
   0xa   :  { %p353_p3 = scmp.ne.s32.totalorder %s18_s10, %s352_s18  ;;  %p358_p5 = scmp.lt.s32.totalorder %s352_s18, %s352_s18 }
   0xc   :  { %p359_p6 = por %p358_p5, %p357_p4 }
   0xe   :  { %p360_p7 = pnand %p359_p6, %p353_p3 }
  0x10   :  { %363 = shalt.err (!%p360_p7)
}
  0x11   :  { %20 = dma.hbm_to_vmem [thread:$0]  %s511_s0, 64, %s18_s10, [#allocation3]  }
  0x12   :  { %408 = dma.done.wait [#allocation3], 64  }
  0x13   :  { %409 = vsyncadd [#allocation3], 4294967232  ;;  %v27_v0 = vlaneseq  ;;  %v24_v3 = vld [vmem:[#allocation2] sm:$0x7]  ;;  %v415_v7 = vmov 0   ;;  %s422_s0 = smov 112  }
  0x14   :  { %v32_v5 = vmul.f32 8.0, %v24_v3  ;;  %vm256_vm0 = vcmp.lt.f32.partialorder %v24_v3, 0.5  ;;  %v416_v29 = vmov 683565275   ;;  %v417_v31 = vmov 2475754826  }
  0x15   :  { %v28_v1 = vshrl.u32 %v27_v0, 7  ;;  %v259_v8 = vsel %vm256_vm0, 1, %v415_v7  ;;  %v418_v33 = vmov 2131351028   ;;  %v419_v35 = vmov 2102212464  }
  0x16   :  { %v420_v37 = vmov 920167782   ;;  %v421_v44 = vmov 1326507024   ;;  %s423_s21 = smov 16   ;;  %s424_s22 = smov [#allocation5]  }
  0x17   :  { %v35_v2 = vsub.s32 2, %v28_v1  ;;  %v29_v4 = vcvt.s32.f32 %v28_v1  ;;  %v41_v6 = vsub.s32 0, %v28_v1  ;;  %v46_v10 = vsub.s32 1, %v28_v1  ;;  %s284_s23 = sshll.u32 %s424_s22, 4  ;;  %s425_s24 = smov [#allocation6]   ;;  %s285_s23 = int_to_ptr.vmem [resolvable:$true] %s284_s23 }
  0x18   :  { %s296_s25 = sshll.u32 %s425_s24, 4  ;;  %s364_s26 = scalar_lea.vmem %s285_s23, 256  ;;  %s297_s25 = int_to_ptr.vmem [resolvable:$true] %s296_s25 }
  0x19   :  { %v36_v9 = vrot.slane %v32_v5, %v35_v2  ;;  %v455_v11 = vrot.slane %v259_v8, %v35_v2  ;;  %v42_v13 = vrot.slane %v24_v3, %v41_v6  ;;  %v47_v15 = vrot.slane %v24_v3, %v46_v10  ;;  %p365_p8 = scmp.ne.s32.totalorder %s285_s23, %s364_s26  ;;  %p369_p9 = scmp.lt.s32.totalorder %s285_s23, %s285_s23 }
  0x1a   :  { %p370_p10 = scmp.lt.s32.totalorder %s364_s26, %s364_s26 }
  0x1b   :  { %v37_v12 = vadd.f32 %v36_v9, %v29_v4 }
  0x1c   :  { %p371_p11 = por %p370_p10, %p369_p9 }
  0x1d   :  { %v38_v14 = vmul.f32 4.0, %v37_v12 }
  0x1e   :  { %p372_p12 = pnand %p371_p11, %p365_p8 }
  0x1f   :  { %v43_v16 = vadd.f32 %v42_v13, %v38_v14 }
  0x21   :  { %v457_v17 = vmul.f32 %v47_v15, %v43_v16 }
  0x23   :  { %v52_v18 = vand.u32 2139095040, %v457_v17  ;;  %v49_v20 = vand.u32 2147483647, %v457_v17  ;;  %vm51_vm8 = vcmp.lt.s32.totalorder %v457_v17, 0  ;;  %vm141_vm0 = vweird.f32 %v457_v17 }
  0x25   :  { %v53_v19 = vshrl.u32 %v52_v18, 23  ;;  %v56_v23 = vand.u32 8388607, %v49_v20  ;;  %vm50_vm9 = vcmp.le.f32.partialorder %v49_v20, 0.7853982 }
  0x27   :  { %v312_v21 = vadd.s32 4294967169, %v53_v19  ;;  %v57_v26 = vor.u32 8388608, %v56_v23 }
  0x29   :  { %v59_v22 = vadd.s32 1, %v312_v21  ;;  %v97_v46 = vshll.u32 %v57_v26, 8 }
  0x2b   :  { %vm60_vm1 = vcmp.gt.s32.totalorder %v59_v22, 0 }
  0x2c   :  { %v61_v24 = vsel %vm60_vm1, %v59_v22, 0  ;;  %vm264_vm1 = vcmp.eq.s32.totalorder %v455_v11, 1 }
  0x2d   :  { %v63_v25 = vand.u32 31, %v61_v24  ;;  %v62_v27 = vshrl.u32 %v61_v24, 5 }
  0x2f   :  { %v64_v28 = vsub.s32 32, %v63_v25  ;;  %v66_v30 = vshll.u32 %v416_v29, %v63_v25  ;;  %v69_v32 = vshll.u32 %v417_v31, %v63_v25  ;;  %v72_v34 = vshll.u32 %v418_v33, %v63_v25 }
  0x30   :  { %v75_v36 = vshll.u32 %v419_v35, %v63_v25  ;;  %v78_v38 = vshll.u32 %v420_v37, %v63_v25  ;;  %vm81_vm2 = vcmp.lt.s32.totalorder %v62_v27, 1  ;;  %vm84_vm3 = vcmp.lt.s32.totalorder %v62_v27, 4 }
  0x31   :  { %v65_v39 = vshrl.u32 %v416_v29, %v64_v28  ;;  %v67_v40 = vshrl.u32 %v417_v31, %v64_v28  ;;  %v70_v41 = vshrl.u32 %v418_v33, %v64_v28  ;;  %v73_v42 = vshrl.u32 %v419_v35, %v64_v28 }
  0x32   :  { %v76_v43 = vshrl.u32 %v420_v37, %v64_v28  ;;  %v79_v45 = vshrl.u32 %v421_v44, %v64_v28  ;;  %vm82_vm4 = vcmp.lt.s32.totalorder %v62_v27, 2  ;;  %vm83_vm5 = vcmp.lt.s32.totalorder %v62_v27, 3 }
  0x33   :  { %v68_v47 = vor.u32 %v67_v40, %v66_v30  ;;  %v71_v48 = vor.u32 %v70_v41, %v69_v32  ;;  %v74_v49 = vor.u32 %v73_v42, %v72_v34 }
  0x34   :  { %v77_v50 = vor.u32 %v76_v43, %v75_v36  ;;  %v80_v51 = vor.u32 %v79_v45, %v78_v38 }
  0x35   :  { %v85_v52 = vsel %vm81_vm2, %v65_v39, %v68_v47  ;;  %v86_v53 = vsel %vm84_vm3, %v74_v49, 2102212464  ;;  %v89_v54 = vsel %vm81_vm2, %v68_v47, %v71_v48  ;;  %v93_v55 = vsel %vm81_vm2, %v71_v48, %v74_v49 }
  0x36   :  { %v87_v56 = vsel %vm83_vm5, %v71_v48, %v86_v53  ;;  %v90_v57 = vsel %vm84_vm3, %v77_v50, 920167782  ;;  %v94_v58 = vsel %vm84_vm3, %v80_v51, 1326507024 }
  0x37   :  { %v91_v59 = vsel %vm83_vm5, %v74_v49, %v90_v57  ;;  %v95_v60 = vsel %vm83_vm5, %v77_v50, %v94_v58  ;;  %v88_v61 = vsel %vm82_vm4, %v85_v52, %v87_v56 }
  0x38   :  { %v92_v62 = vsel %vm82_vm4, %v89_v54, %v91_v59  ;;  %v96_v63 = vsel %vm82_vm4, %v93_v55, %v95_v60  ;;  %v104_v4 = vmul.u32 %v97_v46, %v88_v61 }
  0x39   :  { %v463_v0 = vmul.u32.u64.low %v97_v46, %v96_v63  ;;  %v464_v1 = vmul.u32.u64.high %v97_v46, %v96_v63, %v463_v0  ;;  %v466_v2 = vmul.u32.u64.low %v97_v46, %v92_v62  ;;  %v467_v3 = vmul.u32.u64.high %v97_v46, %v92_v62, %v466_v2 }
  0x3b   :  { %vm106_vm6 = vc.u32 %v464_v1, %v466_v2  ;;  %v107_v5 = vadd.s32 1, %v467_v3  ;;  %v105_v18 = vadd.s32 %v466_v2, %v464_v1 }
  0x3d   :  { %v108_v6 = vsel %vm106_vm6, %v107_v5, %v467_v3 }
  0x3e   :  { %v109_v7 = vadd.s32 %v108_v6, %v104_v4 }
  0x40   :  { %v110_v8 = vadd.s32 536870912, %v109_v7 }
  0x42   :  { %v111_v9 = vshrl.u32 %v110_v8, 30 }
  0x44   :  { %v112_v10 = vshll.u32 %v111_v9, 30  ;;  %v135_v32 = vsub.s32 4, %v111_v9 }
  0x46   :  { %v113_v12 = vsub.s32 %v109_v7, %v112_v10  ;;  %v136_v35 = vsel %vm51_vm8, %v135_v32, %v111_v9 }
  0x47   :  { %v138_v37 = vsel %vm50_vm9, 0, %v136_v35 }
  0x48   :  { %v115_v13 = vsub.s32 0, %v113_v12  ;;  %v245_v38 = vadd.s32 3, %v138_v37  ;;  %v142_v39 = vand.u32 3, %v138_v37 }
  0x4a   :  { %v313_v14 = vmin.u32 %v115_v13, %v113_v12  ;;  %v246_v40 = vand.u32 3, %v245_v38  ;;  %vm147_vm10 = vcmp.eq.s32.totalorder %v142_v39, 2  ;;  %vm144_vm12 = vcmp.eq.s32.totalorder %v142_v39, 0 }
  0x4b   :  { %vm143_vm14 = vcmp.lt.s32.totalorder %v142_v39, 2 }
  0x4c   :  { %v117_v15 = vclz %v313_v14  ;;  %vm251_vm11 = vcmp.eq.s32.totalorder %v246_v40, 2  ;;  %vm248_vm13 = vcmp.eq.s32.totalorder %v246_v40, 0  ;;  %vm247_vm15 = vcmp.lt.s32.totalorder %v246_v40, 2 }
  0x4e   :  { %v314_v16 = vadd.s32 4294967294, %v117_v15 }
  0x50   :  { %vm315_vm7 = vcmp.lt.s32.totalorder %v314_v16, 0 }
  0x51   :  { %v120_v19 = vsel %vm315_vm7, 0, %v314_v16 }
  0x52   :  { %v121_v21 = vsub.s32 32, %v120_v19  ;;  %v122_v22 = vshll.u32 %v113_v12, %v120_v19  ;;  %v125_v23 = vsub.s32 4294967266, %v120_v19 }
  0x54   :  { %v123_v24 = vshrl.u32 %v105_v18, %v121_v21  ;;  %v126_v25 = vadd.s32 127, %v125_v23 }
  0x56   :  { %v124_v26 = vor.u32 %v123_v24, %v122_v22  ;;  %v127_v27 = vshll.u32 %v126_v25, 23 }
  0x58   :  { %v128_v28 = vor.u32 4788187, %v127_v27  ;;  %v131_v29 = vcvt.s32.f32 %v124_v26 }
  0x5a   :  { %v129_v30 = vand.u32 2147483647, %v128_v28 }
  0x5c   :  { %v132_v31 = vmul.f32 %v131_v29, %v129_v30 }
  0x5e   :  { %v133_v33 = vxor.u32 2147483648, %v132_v31 }
  0x60   :  { %v134_v34 = vsel %vm51_vm8, %v133_v33, %v132_v31 }
  0x61   :  { %v137_v36 = vsel %vm50_vm9, %v457_v17, %v134_v34 }
  0x62   :  { %338 = vcosq.f32 %v137_v36 }
  0x63   :  { %340 = vsinq.f32 %v137_v36 }
  0x6c   :  { %v339_v41 = vpop.eup %338 }
  0x6d   :  { %v341_v42 = vpop.eup %340  ;;  %v148_v43 = vxor.u32 2147483648, %v339_v41 }
  0x6e   :  { %v145_v20 = vxor.u32 2147483648, %v341_v42 }
  0x6f   :  { %v149_v44 = vsel %vm147_vm10, %v148_v43, %v341_v42  ;;  %v253_v45 = vsel %vm251_vm11, %v148_v43, %v341_v42 }
  0x70   :  { %v146_v46 = vsel %vm144_vm12, %v339_v41, %v145_v20  ;;  %v250_v47 = vsel %vm248_vm13, %v339_v41, %v145_v20 }
  0x71   :  { %v150_v48 = vsel %vm143_vm14, %v146_v46, %v149_v44  ;;  %v254_v49 = vsel %vm247_vm15, %v250_v47, %v253_v45 }
  0x72   :  { %v151_v50 = vsel %vm141_vm0, nan, %v150_v48  ;;  %v255_v51 = vsel %vm141_vm0, nan, %v254_v49 }
  0x73   :  { %269 = vrot.lane.b32.xlu1 %v151_v50, %s422_s0  ;;  %257 = vrot.lane.b32.xlu0 %v151_v50, %s423_s21 }
  0x77   :  { %272 = vrot.lane.b32.xlu1 %v255_v51, %s422_s0  ;;  %266 = vrot.lane.b32.xlu0 %v255_v51, %s423_s21 }
  0xe5   :  { %v270_v17 = vpop.permute.xlu1 %269  ;;  %v258_v52 = vpop.permute.xlu0 %257 }
  0xe6   :  { %v271_v53 = vsel %vm264_vm1, %v270_v17, %v151_v50  ;;  %v265_v54 = vsel %vm264_vm1, %v151_v50, %v258_v52 }
  0xe7   :  { %277 = vst [vmem:[#allocation5 + $0x8] sm:$0xff] %v271_v53  ;;  %275 = vst [vmem:[#allocation5] sm:$0xff] %v265_v54 }
  0xe8   :  { %375 = shalt.err (!%p372_p12)
}
  0xe9   :  { %s376_s29 = scalar_lea.hbm %s512_s1, 256 }
  0xea   :  { %p377_p13 = scmp.ne.s32.totalorder %s512_s1, %s376_s29  ;;  %p380_p0 = scmp.lt.u32.totalorder %s376_s29, %s512_s1 }
  0xec   :  { %p382_p1 = pnand %p380_p0, %p377_p13 }
  0xee   :  { %385 = shalt.err (!%p382_p1)
}
  0xef   :  { %s426_s6 = smov 128   ;;  %s427_s7 = smov 8   ;;  %v273_v55 = vpop.permute.xlu1 %272  ;;  %v267_v56 = vpop.permute.xlu0 %266 }
  0xf0   :  { %290 = dma.vmem_to_hbm [thread:$0]  %s285_s23, 256, %s512_s1, [#allocation4], %s426_s6, %s426_s6, %s427_s7   ;;  %v274_v57 = vsel %vm264_vm1, %v273_v55, %v255_v51  ;;  %v268_v58 = vsel %vm264_vm1, %v255_v51, %v267_v56 }
  0xf1   :  { %278 = vst [vmem:[#allocation6 + $0x8] sm:$0xff] %v274_v57  ;;  %276 = vst [vmem:[#allocation6] sm:$0xff] %v268_v58  ;;  %s386_s10 = scalar_lea.vmem %s297_s25, 256  ;;  %p391_p3 = scmp.lt.s32.totalorder %s297_s25, %s297_s25 }
  0xf2   :  { %p387_p2 = scmp.ne.s32.totalorder %s297_s25, %s386_s10  ;;  %p392_p4 = scmp.lt.s32.totalorder %s386_s10, %s386_s10 }
  0xf4   :  { %p393_p5 = por %p392_p4, %p391_p3 }
  0xf6   :  { %p394_p6 = pnand %p393_p5, %p387_p2 }
  0xf8   :  { %397 = shalt.err (!%p394_p6)
}
  0xf9   :  { %s398_s12 = scalar_lea.hbm %s513_s2, 256 }
  0xfa   :  { %p399_p7 = scmp.ne.s32.totalorder %s513_s2, %s398_s12  ;;  %p402_p8 = scmp.lt.u32.totalorder %s398_s12, %s513_s2 }
  0xfc   :  { %p404_p9 = pnand %p402_p8, %p399_p7 }
  0xfe   :  { %407 = shalt.err (!%p404_p9)
}
  0xff   :  { %302 = dma.vmem_to_hbm [thread:$0]  %s297_s25, 256, %s513_s2, [#allocation7], %s426_s6, %s426_s6, %s427_s7  }
 0x100   :  { %410 = dma.done.wait [#allocation4], 256  }
 0x101   :  { %411 = vsyncadd [#allocation4], 4294967040 }
 0x102   :  { %412 = dma.done.wait [#allocation7], 256  }
 0x103   :  { %413 = vsyncadd [#allocation7], 4294967040 }
 0x104   :  { %309 = vsyncpa [#allocation3], 1 }
 0x105   :  { %310 = vsyncpa [#allocation4], 1 }
 0x106   :  { %311 = vsyncpa [#allocation7], 1 }

</bundles_post_ra>
